<compile_context>
chip_gen: v5e
topology: v5e:2x2
jax: 0.10.0
libtpu: 0.0.40
codegen_flags: <defaults>
</compile_context>

<pallas_src>
import functools

import jax
import jax.numpy as jnp
from jax.experimental import pallas as pl
from jax.experimental.pallas import tpu as pltpu

LANE = 128
H1, H2 = 192, 96          # logical hidden dims from the PyTorch module
H1P, H2P = 256, 128       # lane-padded hidden dims used inside the kernel


def _round_up(n, m):
    return (n + m - 1) // m * m


def _device_kind():
    try:
        return jax.devices()[0].device_kind.lower()
    except Exception:       # defensive: no device visible at import time
        return ""


_KIND = _device_kind()
_IS_V5E = ("v5 lite" in _KIND) or ("v5e" in _KIND) or ("v5lite" in _KIND)
_NUM_TC = 2 if "v7" in _KIND else 1                 # v7x: 2 TensorCores per chip
# bf16 VALU exists on v6e/v7x; keep the f32 VPU path on v5e.
_ACT_DTYPE = jnp.float32 if _IS_V5E else jnp.bfloat16
# v7x: 64 MiB VMEM (32 MiB scoped default); v5e/v6e: 128 MiB.
_BLOCK_B_CAP = 2048 if _NUM_TC > 1 else 4096
_VMEM_LIMIT_BYTES = 32 * 1024 * 1024                # safe on every generation


def ae_kernel(x_ref,
              w1_ref, b1_ref,
              w2_ref, b2_ref,
              w3_ref, b3_ref,
              w4_ref, b4_ref,
              o_ref, *, act_dtype):
    """Fused AE forward for one batch tile.

    All four matmuls hit the MXU with bf16 operands / f32 accumulation.  Bias-add is
    f32; ReLU runs in `act_dtype` (bf16 on v6e/v7x, f32 on v5e).  Intermediate
    activations never touch HBM.
    """
    zero = jnp.zeros((), act_dtype)

    def layer(a_bf16, w_ref, b_ref):
        y = jnp.dot(a_bf16, w_ref[...], preferred_element_type=jnp.float32) + b_ref[...]
        y = jnp.maximum(y.astype(act_dtype), zero)      # ReLU (commutes with downcast)
        return y.astype(jnp.bfloat16)                   # MXU operand dtype

    a = x_ref[...].astype(jnp.bfloat16)
    a = layer(a, w1_ref, b1_ref)      # encoder_hidden_layer + relu
    a = layer(a, w2_ref, b2_ref)      # encoder_output_layer + relu
    a = layer(a, w3_ref, b3_ref)      # decoder_hidden_layer + relu
    a = layer(a, w4_ref, b4_ref)      # decoder_output_layer + relu
    o_ref[...] = a.astype(o_ref.dtype)


@functools.partial(jax.jit, static_argnames=("block_b",))
def ae_forward(x, params, block_b=512):
    """Fused AE forward. x: [B, D]. Returns the bf16 reconstruction [B, D]."""
    B, D = x.shape
    Dp = params["w1"].shape[0]          # lane-padded input/output feature dim

    # --- batch tiling: even tiles, minimal zero padding, 16-row (bf16) alignment ---
    block_b = max(16, min(block_b, _BLOCK_B_CAP))
    n_steps = pl.cdiv(B, block_b)
    if _NUM_TC > 1:
        # v7x: make sure both TensorCores get at least one batch tile.
        n_steps = max(n_steps, min(_NUM_TC, pl.cdiv(B, 16)))
    bb = _round_up(pl.cdiv(B, n_steps), 16)
    Bp = _round_up(B, bb)
    n_tiles = Bp // bb

    # --- pad batch rows / feature lanes; fold the f32->bf16 downcast into the copy ---
    if (Bp, Dp) != (B, D):
        xp = jnp.zeros((Bp, Dp), jnp.bfloat16).at[:B, :D].set(x.astype(jnp.bfloat16))
    else:
        xp = x      # no padding copy needed: pass as-is, kernel downcasts in VMEM

    w1, b1 = params["w1"], params["b1"]
    w2, b2 = params["w2"], params["b2"]
    w3, b3 = params["w3"], params["b3"]
    w4, b4 = params["w4"], params["b4"]

    # Constant index_map -> Pallas DMAs weights/biases into VMEM once.
    full = lambda a: pl.BlockSpec(a.shape, lambda i: (0, 0))

    grid_spec = pl.GridSpec(
        grid=(n_tiles,),
        in_specs=[
            pl.BlockSpec((bb, Dp), lambda i: (i, 0)),       # x tile
            full(w1), full(b1),
            full(w2), full(b2),
            full(w3), full(b3),
            full(w4), full(b4),
        ],
        out_specs=pl.BlockSpec((bb, Dp), lambda i: (i, 0)),
    )

    out_dtype = jnp.bfloat16
    flops = 2 * Bp * (Dp * H1P + H1P * H2P + H2P * H1P + H1P * Dp)
    bytes_accessed = (
        xp.size * xp.dtype.itemsize                         # input
        + Bp * Dp * jnp.dtype(out_dtype).itemsize           # output
        + sum(p.size * p.dtype.itemsize for p in params.values())
    )

    if _NUM_TC > 1 and n_tiles > 1:
        dim_sem = (pltpu.CORE_PARALLEL,)    # shard batch tiles across v7x's 2 TCs
    else:
        dim_sem = ("parallel",)

    out = pl.pallas_call(
        functools.partial(ae_kernel, act_dtype=_ACT_DTYPE),
        out_shape=jax.ShapeDtypeStruct((Bp, Dp), out_dtype),
        grid_spec=grid_spec,
        compiler_params=pltpu.CompilerParams(
            dimension_semantics=dim_sem,
            vmem_limit_bytes=_VMEM_LIMIT_BYTES,
        ),
        cost_estimate=pl.CostEstimate(
            flops=flops, transcendentals=0, bytes_accessed=bytes_accessed),
    )(xp, w1, b1, w2, b2, w3, b3, w4, b4)

    return out[:B, :D]


def init_params(key, input_shape):
    """nn.Linear-style init (U(-1/sqrt(in), 1/sqrt(in))), stored transposed [in, out],
    zero-padded to lane multiples, weights in bf16 (biases stay f32)."""
    d_pad = _round_up(input_shape, LANE)
    dims = [
        (input_shape, H1, d_pad, H1P),
        (H1, H2, H1P, H2P),
        (H2, H1, H2P, H1P),
        (H1, input_shape, H1P, d_pad),
    ]
    params = {}
    for idx, (fi, fo, fip, fop) in enumerate(dims, start=1):
        key, kw, kb = jax.random.split(key, 3)
        bound = float(fi) ** -0.5
        w = jax.random.uniform(kw, (fi, fo), jnp.float32, minval=-bound, maxval=bound)
        b = jax.random.uniform(kb, (1, fo), jnp.float32, minval=-bound, maxval=bound)
        wp = jnp.zeros((fip, fop), jnp.float32).at[:fi, :fo].set(w)
        bp = jnp.zeros((1, fop), jnp.float32).at[:, :fo].set(b)
        params[f"w{idx}"] = wp.astype(jnp.bfloat16)
        params[f"b{idx}"] = bp
    return params


def ae_forward_ref(x, params):
    """Pure-JAX reference mirroring the kernel's bf16-operand / f32-accumulate math."""
    B, D = x.shape
    Dp = params["w1"].shape[0]
    act = jnp.zeros((B, Dp), jnp.float32).at[:, :D].set(
        x.astype(jnp.bfloat16).astype(jnp.float32))
    for i in range(1, 5):
        y = act @ params[f"w{i}"].astype(jnp.float32) + params[f"b{i}"]
        act = jnp.maximum(y, 0.0).astype(jnp.bfloat16).astype(jnp.float32)
    return act[:, :D].astype(jnp.bfloat16)


def ae_forward_f32_ref(x, params):
    """Full-f32 reference matching the original PyTorch module's semantics."""
    B, D = x.shape
    Dp = params["w1"].shape[0]
    act = jnp.zeros((B, Dp), jnp.float32).at[:, :D].set(x)
    for i in range(1, 5):
        act = jax.nn.relu(act @ params[f"w{i}"].astype(jnp.float32) + params[f"b{i}"])
    return act[:, :D]


if __name__ == "__main__":
    INPUT_SHAPE = 64     # kwargs['input_shape'] -- small example size
    BATCH = 32           # small example batch

    key = jax.random.PRNGKey(0)
    key, kx = jax.random.split(key)
    x = jax.random.normal(kx, (BATCH, INPUT_SHAPE), jnp.float32)
    params = init_params(key, INPUT_SHAPE)

    out = jax.block_until_ready(ae_forward(x, params))
    assert out.shape == (BATCH, INPUT_SHAPE)

    # Tight check vs a reference using identical bf16-rounded operands/output.
    ref = ae_forward_ref(x, params)
    assert jnp.allclose(out.astype(jnp.float32), ref.astype(jnp.float32),
                        atol=2e-2, rtol=2e-2), "mismatch vs bf16 reference"

    # Loose sanity check vs the original f32 module semantics (bf16 rounding error).
    ref32 = ae_forward_f32_ref(x, params)
    assert jnp.allclose(out.astype(jnp.float32), ref32,
                        atol=0.1, rtol=0.1), "mismatch vs f32 reference"

    print("KERNEL_OK")
</pallas_src>

<mosaic_0001>
module attributes {stable_mosaic.version = 11 : i64} {
  func.func @ae_kernel(%arg0: i32, %arg1: memref<32x128xbf16, #tpu.memory_space<vmem>>, %arg2: memref<128x256xbf16, #tpu.memory_space<vmem>>, %arg3: memref<1x256xf32, #tpu.memory_space<vmem>>, %arg4: memref<256x128xbf16, #tpu.memory_space<vmem>>, %arg5: memref<1x128xf32, #tpu.memory_space<vmem>>, %arg6: memref<128x256xbf16, #tpu.memory_space<vmem>>, %arg7: memref<1x256xf32, #tpu.memory_space<vmem>>, %arg8: memref<256x128xbf16, #tpu.memory_space<vmem>>, %arg9: memref<1x128xf32, #tpu.memory_space<vmem>>, %arg10: memref<32x128xbf16, #tpu.memory_space<vmem>>) attributes {dimension_semantics = [#tpu.dimension_semantics<parallel>], iteration_bounds = array<i64: 1>, scalar_prefetch = 0 : i64, scratch_operands = 0 : i64, tpu.core_type = #tpu.core_type<tc>, window_params = [{transform_indices = @transform_0, window_bounds = array<i64: 32, 128>}, {pipeline_mode = #tpu.pipeline_mode<synchronous>, transform_indices = @transform_1, window_bounds = array<i64: 128, 256>}, {pipeline_mode = #tpu.pipeline_mode<synchronous>, transform_indices = @transform_2, window_bounds = array<i64: 1, 256>}, {pipeline_mode = #tpu.pipeline_mode<synchronous>, transform_indices = @transform_3, window_bounds = array<i64: 256, 128>}, {pipeline_mode = #tpu.pipeline_mode<synchronous>, transform_indices = @transform_4, window_bounds = array<i64: 1, 128>}, {pipeline_mode = #tpu.pipeline_mode<synchronous>, transform_indices = @transform_5, window_bounds = array<i64: 128, 256>}, {pipeline_mode = #tpu.pipeline_mode<synchronous>, transform_indices = @transform_6, window_bounds = array<i64: 1, 256>}, {pipeline_mode = #tpu.pipeline_mode<synchronous>, transform_indices = @transform_7, window_bounds = array<i64: 256, 128>}, {pipeline_mode = #tpu.pipeline_mode<synchronous>, transform_indices = @transform_8, window_bounds = array<i64: 1, 128>}, {transform_indices = @transform_9, window_bounds = array<i64: 32, 128>}]} {
    %c0 = arith.constant 0 : index
    %c0_0 = arith.constant 0 : index
    %0 = vector.load %arg1[%c0, %c0_0] : memref<32x128xbf16, #tpu.memory_space<vmem>>, vector<32x128xbf16>
    %c0_1 = arith.constant 0 : index
    %c0_2 = arith.constant 0 : index
    %1 = vector.load %arg2[%c0_1, %c0_2] : memref<128x256xbf16, #tpu.memory_space<vmem>>, vector<128x256xbf16>
    %cst = arith.constant dense<0.000000e+00> : vector<32x256xf32>
    %2 = tpu.matmul %0, %1, %cst {dimension_numbers = #tpu.dot_dimension_numbers<[1], [0], [0], [1], [0, 0, 1, 1], [], []>} : vector<32x128xbf16>, vector<128x256xbf16>, vector<32x256xf32> -> vector<32x256xf32>
    %c0_3 = arith.constant 0 : index
    %c0_4 = arith.constant 0 : index
    %3 = vector.load %arg3[%c0_3, %c0_4] : memref<1x256xf32, #tpu.memory_space<vmem>>, vector<1x256xf32>
    %4 = vector.broadcast %3 : vector<1x256xf32> to vector<32x256xf32>
    %5 = arith.addf %2, %4 : vector<32x256xf32>
    %6 = arith.truncf %5 : vector<32x256xf32> to vector<32x256xbf16>
    %cst_5 = arith.constant 0.000000e+00 : bf16
    %7 = vector.broadcast %cst_5 : bf16 to vector<32x256xbf16>
    %8 = arith.maximumf %6, %7 : vector<32x256xbf16>
    %c0_6 = arith.constant 0 : index
    %c0_7 = arith.constant 0 : index
    %9 = vector.load %arg4[%c0_6, %c0_7] : memref<256x128xbf16, #tpu.memory_space<vmem>>, vector<256x128xbf16>
    %cst_8 = arith.constant dense<0.000000e+00> : vector<32x128xf32>
    %10 = tpu.matmul %8, %9, %cst_8 {dimension_numbers = #tpu.dot_dimension_numbers<[1], [0], [0], [1], [0, 0, 1, 1], [], []>} : vector<32x256xbf16>, vector<256x128xbf16>, vector<32x128xf32> -> vector<32x128xf32>
    %c0_9 = arith.constant 0 : index
    %c0_10 = arith.constant 0 : index
    %11 = vector.load %arg5[%c0_9, %c0_10] : memref<1x128xf32, #tpu.memory_space<vmem>>, vector<1x128xf32>
    %12 = vector.broadcast %11 : vector<1x128xf32> to vector<32x128xf32>
    %13 = arith.addf %10, %12 : vector<32x128xf32>
    %14 = arith.truncf %13 : vector<32x128xf32> to vector<32x128xbf16>
    %cst_11 = arith.constant 0.000000e+00 : bf16
    %15 = vector.broadcast %cst_11 : bf16 to vector<32x128xbf16>
    %16 = arith.maximumf %14, %15 : vector<32x128xbf16>
    %c0_12 = arith.constant 0 : index
    %c0_13 = arith.constant 0 : index
    %17 = vector.load %arg6[%c0_12, %c0_13] : memref<128x256xbf16, #tpu.memory_space<vmem>>, vector<128x256xbf16>
    %cst_14 = arith.constant dense<0.000000e+00> : vector<32x256xf32>
    %18 = tpu.matmul %16, %17, %cst_14 {dimension_numbers = #tpu.dot_dimension_numbers<[1], [0], [0], [1], [0, 0, 1, 1], [], []>} : vector<32x128xbf16>, vector<128x256xbf16>, vector<32x256xf32> -> vector<32x256xf32>
    %c0_15 = arith.constant 0 : index
    %c0_16 = arith.constant 0 : index
    %19 = vector.load %arg7[%c0_15, %c0_16] : memref<1x256xf32, #tpu.memory_space<vmem>>, vector<1x256xf32>
    %20 = vector.broadcast %19 : vector<1x256xf32> to vector<32x256xf32>
    %21 = arith.addf %18, %20 : vector<32x256xf32>
    %22 = arith.truncf %21 : vector<32x256xf32> to vector<32x256xbf16>
    %cst_17 = arith.constant 0.000000e+00 : bf16
    %23 = vector.broadcast %cst_17 : bf16 to vector<32x256xbf16>
    %24 = arith.maximumf %22, %23 : vector<32x256xbf16>
    %c0_18 = arith.constant 0 : index
    %c0_19 = arith.constant 0 : index
    %25 = vector.load %arg8[%c0_18, %c0_19] : memref<256x128xbf16, #tpu.memory_space<vmem>>, vector<256x128xbf16>
    %cst_20 = arith.constant dense<0.000000e+00> : vector<32x128xf32>
    %26 = tpu.matmul %24, %25, %cst_20 {dimension_numbers = #tpu.dot_dimension_numbers<[1], [0], [0], [1], [0, 0, 1, 1], [], []>} : vector<32x256xbf16>, vector<256x128xbf16>, vector<32x128xf32> -> vector<32x128xf32>
    %c0_21 = arith.constant 0 : index
    %c0_22 = arith.constant 0 : index
    %27 = vector.load %arg9[%c0_21, %c0_22] : memref<1x128xf32, #tpu.memory_space<vmem>>, vector<1x128xf32>
    %28 = vector.broadcast %27 : vector<1x128xf32> to vector<32x128xf32>
    %29 = arith.addf %26, %28 : vector<32x128xf32>
    %30 = arith.truncf %29 : vector<32x128xf32> to vector<32x128xbf16>
    %cst_23 = arith.constant 0.000000e+00 : bf16
    %31 = vector.broadcast %cst_23 : bf16 to vector<32x128xbf16>
    %32 = arith.maximumf %30, %31 : vector<32x128xbf16>
    %c0_24 = arith.constant 0 : index
    %c0_25 = arith.constant 0 : index
    %33 = vector.load %arg10[%c0_24, %c0_25] : memref<32x128xbf16, #tpu.memory_space<vmem>>, vector<32x128xbf16>
    tpu.vector_store %arg10[%c0_24, %c0_25], %32 {strides = array<i32>} : memref<32x128xbf16, #tpu.memory_space<vmem>>, vector<32x128xbf16>,
    return
  }
  func.func @transform_0(%arg0: i32) -> (i32, i32) {
    %c0_i32 = arith.constant 0 : i32
    %c0_i32_0 = arith.constant 0 : i32
    return %arg0, %c0_i32 : i32, i32
  }
  func.func @transform_1(%arg0: i32) -> (i32, i32) {
    %c0_i32 = arith.constant 0 : i32
    %c0_i32_0 = arith.constant 0 : i32
    %c0_i32_1 = arith.constant 0 : i32
    return %c0_i32, %c0_i32_0 : i32, i32
  }
  func.func @transform_2(%arg0: i32) -> (i32, i32) {
    %c0_i32 = arith.constant 0 : i32
    %c0_i32_0 = arith.constant 0 : i32
    %c0_i32_1 = arith.constant 0 : i32
    return %c0_i32, %c0_i32_0 : i32, i32
  }
  func.func @transform_3(%arg0: i32) -> (i32, i32) {
    %c0_i32 = arith.constant 0 : i32
    %c0_i32_0 = arith.constant 0 : i32
    %c0_i32_1 = arith.constant 0 : i32
    return %c0_i32, %c0_i32_0 : i32, i32
  }
  func.func @transform_4(%arg0: i32) -> (i32, i32) {
    %c0_i32 = arith.constant 0 : i32
    %c0_i32_0 = arith.constant 0 : i32
    %c0_i32_1 = arith.constant 0 : i32
    return %c0_i32, %c0_i32_0 : i32, i32
  }
  func.func @transform_5(%arg0: i32) -> (i32, i32) {
    %c0_i32 = arith.constant 0 : i32
    %c0_i32_0 = arith.constant 0 : i32
    %c0_i32_1 = arith.constant 0 : i32
    return %c0_i32, %c0_i32_0 : i32, i32
  }
  func.func @transform_6(%arg0: i32) -> (i32, i32) {
    %c0_i32 = arith.constant 0 : i32
    %c0_i32_0 = arith.constant 0 : i32
    %c0_i32_1 = arith.constant 0 : i32
    return %c0_i32, %c0_i32_0 : i32, i32
  }
  func.func @transform_7(%arg0: i32) -> (i32, i32) {
    %c0_i32 = arith.constant 0 : i32
    %c0_i32_0 = arith.constant 0 : i32
    %c0_i32_1 = arith.constant 0 : i32
    return %c0_i32, %c0_i32_0 : i32, i32
  }
  func.func @transform_8(%arg0: i32) -> (i32, i32) {
    %c0_i32 = arith.constant 0 : i32
    %c0_i32_0 = arith.constant 0 : i32
    %c0_i32_1 = arith.constant 0 : i32
    return %c0_i32, %c0_i32_0 : i32, i32
  }
  func.func @transform_9(%arg0: i32) -> (i32, i32) {
    %c0_i32 = arith.constant 0 : i32
    %c0_i32_0 = arith.constant 0 : i32
    return %arg0, %c0_i32 : i32, i32
  }
}

</mosaic_0001>

<bundles_post_ra>
// kernel: ae_forward.1
= control target key start
LH: loop header
LB: loop body
LE: loop exit
PB: predicated region body
PF: predicated region fallthrough
CT: control target
= control target key end

     0   :  { %14 = vsyncpa [#allocation3], 0  ;;  %s1416_s0 = inlined_call_operand.vmem [shape: bf16[32,128], index: 0, kind: input, shape index: {}]   ;;  %s1417_s1 = inlined_call_operand.hbm [shape: bf16[128,256], index: 1, kind: input, shape index: {}]   ;;  %s1418_s2 = inlined_call_operand.vmem [shape: f32[1,256], index: 2, kind: input, shape index: {}]   ;;  %s1419_s3 = inlined_call_operand.hbm [shape: bf16[256,128], index: 3, kind: input, shape index: {}]   ;;  %s1420_s4 = inlined_call_operand.vmem [shape: f32[1,128], index: 4, kind: input, shape index: {}]   ;;  %s1421_s5 = inlined_call_operand.hbm [shape: bf16[128,256], index: 5, kind: input, shape index: {}]   ;;  %s1422_s6 = inlined_call_operand.vmem [shape: f32[1,256], index: 6, kind: input, shape index: {}]   ;;  %s1423_s7 = inlined_call_operand.hbm [shape: bf16[256,128], index: 7, kind: input, shape index: {}]   ;;  %s1424_s8 = inlined_call_operand.vmem [shape: f32[1,128], index: 8, kind: input, shape index: {}]   ;;  %s1425_s9 = inlined_call_operand.hbm [shape: bf16[32,128], index: 9, kind: output, shape index: {}]  }
   0x1   :  { %15 = vsyncpa [#allocation6], 0 }
   0x2   :  { %16 = vsyncpa [#allocation9], 0  ;;  %s39_s11 = sshll.u32 %s1419_s3, 4  ;;  %s40_s11 = int_to_ptr.hbm [resolvable:$true] %s39_s11 }
   0x3   :  { %17 = vsyncpa [#allocation4], 0  ;;  %s1315_s12 = smov [#allocation5]   ;;  %s24_s16 = sshll.u32 %s1417_s1, 4  ;;  %s25_s16 = int_to_ptr.hbm [resolvable:$true] %s24_s16 }
   0x4   :  { %s41_s13 = sshll.u32 %s1315_s12, 4  ;;  %s1316_s17 = smov 64   ;;  %s42_s13 = int_to_ptr.vmem [resolvable:$true] %s41_s13 }
   0x5   :  { %s1317_s18 = smov 4   ;;  %s1318_s19 = smov [#allocation2]  }
   0x6   :  { %47 = dma.hbm_to_vmem [thread:$0]  %s40_s11, 2048, %s42_s13, [#allocation6], %s1316_s17, %s1316_s17, %s1317_s18  }
   0x7   :  { %s26_s20 = sshll.u32 %s1318_s19, 4  ;;  %s1319_s3 = smov 128   ;;  %s27_s20 = int_to_ptr.vmem [resolvable:$true] %s26_s20 }
   0x8   :  { %s1320_s21 = smov 8   ;;  %s54_s24 = sshll.u32 %s1421_s5, 4  ;;  %s55_s24 = int_to_ptr.hbm [resolvable:$true] %s54_s24 }
   0x9   :  { %32 = dma.hbm_to_vmem [thread:$0]  %s25_s16, 2048, %s27_s20, [#allocation3], %s1319_s3, %s1319_s3, %s1320_s21  }
   0xa   :  { %s1321_s25 = smov [#allocation7]   ;;  %s69_s28 = sshll.u32 %s1423_s7, 4  ;;  %s70_s28 = int_to_ptr.hbm [resolvable:$true] %s69_s28 }
   0xb   :  { %s56_s1 = sshll.u32 %s1321_s25, 4  ;;  %s1322_s29 = smov [#allocation8]   ;;  %s57_s1 = int_to_ptr.vmem [resolvable:$true] %s56_s1 }
   0xc   :  { %62 = dma.hbm_to_vmem [thread:$0]  %s55_s24, 2048, %s57_s1, [#allocation6], %s1319_s3, %s1319_s3, %s1320_s21  }
   0xd   :  { %s71_s30 = sshll.u32 %s1322_s29, 4  ;;  %s72_s30 = int_to_ptr.vmem [resolvable:$true] %s71_s30 }
   0xe   :  { %77 = dma.hbm_to_vmem [thread:$0]  %s70_s28, 2048, %s72_s30, [#allocation9], %s1316_s17, %s1316_s17, %s1317_s18  }
   0xf   :  { %1307 = dma.done.wait [#allocation3], 2048  }
  0x10   :  { %1308 = vsyncadd [#allocation3], 4294965248 }
  0x11   :  { %1309 = dma.done.wait [#allocation6], 4096  }
  0x12   :  { %1310 = vsyncadd [#allocation6], 4294963200 }
  0x13   :  { %1311 = dma.done.wait [#allocation9], 2048  }
  0x14   :  { %1312 = vsyncadd [#allocation9], 4294965248  ;;  %v901_v0 = vld [vmem:[#allocation2 + $0x70] sm:$0xf]  ;;  %v1116_v1 = vld [vmem:[#allocation2 + $0x74] sm:$0xf0] }
  0x15   :  { %v1115_v2 = vld [vmem:[#allocation2 + $0x74] sm:$0xf]  ;;  %v902_v3 = vor.u32 %v1116_v1, %v901_v0  ;;  %v903_v4 = vld [vmem:[#allocation2 + $0x78] sm:$0xf0]  ;;  %v893_v5 = vld [vmem:[#allocation2 + $0x60] sm:$0xf] }
  0x16   :  { %v1114_v6 = vld [vmem:[#allocation2 + $0x64] sm:$0xf0]  ;;  %v906_v7 = vor.u32 %v1115_v2, %v903_v4  ;;  %v1113_v8 = vld [vmem:[#allocation2 + $0x64] sm:$0xf]  ;;  %v895_v9 = vld [vmem:[#allocation2 + $0x68] sm:$0xf0] }
  0x17   :  { %214 = vmatpush.bf16.msra.mxu0 %v902_v3  ;;  %v894_v10 = vor.u32 %v1114_v6, %v893_v5  ;;  %v898_v11 = vor.u32 %v1113_v8, %v895_v9  ;;  %v885_v12 = vld [vmem:[#allocation2 + $0x50] sm:$0xf]  ;;  %v1112_v13 = vld [vmem:[#allocation2 + $0x54] sm:$0xf0]  ;;  %v1111_v14 = vld [vmem:[#allocation2 + $0x54] sm:$0xf] }
  0x18   :  { %233 = vmatpush.bf16.msra.mxu1 %v906_v7  ;;  %v887_v15 = vld [vmem:[#allocation2 + $0x58] sm:$0xf0]  ;;  %v886_v16 = vor.u32 %v1112_v13, %v885_v12  ;;  %v877_v18 = vld [vmem:[#allocation2 + $0x40] sm:$0xf]  ;;  %v1110_v19 = vld [vmem:[#allocation2 + $0x44] sm:$0xf0] }
  0x19   :  { %v890_v17 = vor.u32 %v1111_v14, %v887_v15  ;;  %v1109_v20 = vld [vmem:[#allocation2 + $0x44] sm:$0xf]  ;;  %v879_v21 = vld [vmem:[#allocation2 + $0x48] sm:$0xf0]  ;;  %v878_v22 = vor.u32 %v1110_v19, %v877_v18  ;;  %v869_v24 = vld [vmem:[#allocation2 + $0x30] sm:$0xf] }
  0x1a   :  { %v882_v23 = vor.u32 %v1109_v20, %v879_v21  ;;  %v1108_v25 = vld [vmem:[#allocation2 + $0x34] sm:$0xf0]  ;;  %v1107_v26 = vld [vmem:[#allocation2 + $0x34] sm:$0xf]  ;;  %v871_v27 = vld [vmem:[#allocation2 + $0x38] sm:$0xf0] }
  0x1b   :  { %215 = vmatpush.bf16.msra.mxu0 %v894_v10  ;;  %v870_v28 = vor.u32 %v1108_v25, %v869_v24  ;;  %v874_v29 = vor.u32 %v1107_v26, %v871_v27  ;;  %v861_v30 = vld [vmem:[#allocation2 + $0x20] sm:$0xf]  ;;  %v1106_v31 = vld [vmem:[#allocation2 + $0x24] sm:$0xf0]  ;;  %v1105_v32 = vld [vmem:[#allocation2 + $0x24] sm:$0xf] }
  0x1c   :  { %234 = vmatpush.bf16.msra.mxu1 %v898_v11  ;;  %v863_v33 = vld [vmem:[#allocation2 + $0x28] sm:$0xf0]  ;;  %v862_v34 = vor.u32 %v1106_v31, %v861_v30  ;;  %v1124_v35 = vld [vmem:[#allocation5 + $0x38] sm:$0xff]  ;;  %v853_v38 = vld [vmem:[#allocation2 + $0x10] sm:$0xf]  ;;  %s1323_s16 = smov [#allocation10]  }
  0x1d   :  { %v1132_v36 = vld [vmem:[#allocation5 + $0x78] sm:$0xff]  ;;  %v866_v37 = vor.u32 %v1105_v32, %v863_v33  ;;  %v1103_v40 = vld [vmem:[#allocation2 + $0x14] sm:$0xf]  ;;  %408 = vmatpush.bf16.msra.mxu2 %v1124_v35  ;;  %v845_v46 = vld [vmem:[#allocation2] sm:$0xf]  ;;  %s820_s3 = sshll.u32 %s1425_s9, 4  ;;  %s821_s3 = int_to_ptr.hbm [resolvable:$true] %s820_s3 }
  0x1e   :  { %v1104_v39 = vld [vmem:[#allocation2 + $0x14] sm:$0xf0]  ;;  %v855_v41 = vld [vmem:[#allocation2 + $0x18] sm:$0xf0]  ;;  %427 = vmatpush.bf16.msra.mxu3 %v1132_v36  ;;  %v1123_v42 = vld [vmem:[#allocation5 + $0x30] sm:$0xff] }
  0x1f   :  { %216 = vmatpush.bf16.msra.mxu0 %v886_v16  ;;  %v1131_v43 = vld [vmem:[#allocation5 + $0x70] sm:$0xff]  ;;  %v854_v44 = vor.u32 %v1104_v39, %v853_v38  ;;  %v858_v45 = vor.u32 %v1103_v40, %v855_v41  ;;  %v1102_v47 = vld [vmem:[#allocation2 + $0x4] sm:$0xf0]  ;;  %v1101_v48 = vld [vmem:[#allocation2 + $0x4] sm:$0xf] }
  0x20   :  { %235 = vmatpush.bf16.msra.mxu1 %v890_v17  ;;  %v847_v49 = vld [vmem:[#allocation2 + $0x8] sm:$0xf0]  ;;  %v846_v52 = vor.u32 %v1102_v47, %v845_v46  ;;  %v1121_v54 = vld [vmem:[#allocation5 + $0x20] sm:$0xff]  ;;  %v1120_v58 = vld [vmem:[#allocation5 + $0x18] sm:$0xff] }
  0x21   :  { %409 = vmatpush.bf16.msra.mxu2 %v1123_v42  ;;  %v1122_v50 = vld [vmem:[#allocation5 + $0x28] sm:$0xff]  ;;  %v850_v53 = vor.u32 %v1101_v48, %v847_v49  ;;  %v1129_v55 = vld [vmem:[#allocation5 + $0x60] sm:$0xff]  ;;  %v1128_v59 = vld [vmem:[#allocation5 + $0x58] sm:$0xff] }
  0x22   :  { %428 = vmatpush.bf16.msra.mxu3 %v1131_v43  ;;  %v1130_v51 = vld [vmem:[#allocation5 + $0x68] sm:$0xff]  ;;  %v1099_v56 = vld [vmem:[%s1416_s0] sm:$0xff]  ;;  %v1119_v60 = vld [vmem:[#allocation5 + $0x10] sm:$0xff] }
  0x23   :  { %217 = vmatpush.bf16.msra.mxu0 %v878_v22  ;;  %v1100_v57 = vld [vmem:[%s1416_s0 + $0x8] sm:$0xff]  ;;  %v1127_v61 = vld [vmem:[#allocation5 + $0x50] sm:$0xff]  ;;  %v1117_v0 = vld [vmem:[#allocation5] sm:$0xff] }
  0x24   :  { %236 = vmatpush.bf16.msra.mxu1 %v882_v23  ;;  %v1118_v62 = vld [vmem:[#allocation5 + $0x8] sm:$0xff]  ;;  %v1125_v1 = vld [vmem:[#allocation5 + $0x40] sm:$0xff]  ;;  %v1029_v4 = vld [vmem:[#allocation7 + $0x70] sm:$0xf] }
  0x25   :  { %410 = vmatpush.bf16.msra.mxu2 %v1122_v50  ;;  %v1126_v63 = vld [vmem:[#allocation5 + $0x48] sm:$0xff]  ;;  %v116_v2 = vld [vmem:[%s1418_s2] sm:$0x3]  ;;  %v1148_v5 = vld [vmem:[#allocation7 + $0x74] sm:$0xf0] }
  0x26   :  { %429 = vmatpush.bf16.msra.mxu3 %v1130_v51  ;;  %v1147_v6 = vld [vmem:[#allocation7 + $0x74] sm:$0xf]  ;;  %v1030_v8 = vor.u32 %v1148_v5, %v1029_v4  ;;  %v1031_v9 = vld [vmem:[#allocation7 + $0x78] sm:$0xf0]  ;;  %v1021_v10 = vld [vmem:[#allocation7 + $0x60] sm:$0xf] }
  0x27   :  { %218 = vmatpush.bf16.msra.mxu0 %v870_v28  ;;  %v1146_v11 = vld [vmem:[#allocation7 + $0x64] sm:$0xf0]  ;;  %v1034_v12 = vor.u32 %v1147_v6, %v1031_v9  ;;  %v1145_v13 = vld [vmem:[#allocation7 + $0x64] sm:$0xf]  ;;  %v1023_v14 = vld [vmem:[#allocation7 + $0x68] sm:$0xf0] }
  0x28   :  { %237 = vmatpush.bf16.msra.mxu1 %v874_v29  ;;  %v118_v15 = vperm.slane %v116_v2, 0  ;;  %v1022_v16 = vor.u32 %v1146_v11, %v1021_v10  ;;  %v119_v17 = vperm.slane %v116_v2, 1  ;;  %v1026_v18 = vor.u32 %v1145_v13, %v1023_v14  ;;  %v1013_v19 = vld [vmem:[#allocation7 + $0x50] sm:$0xf]  ;;  %v1144_v20 = vld [vmem:[#allocation7 + $0x54] sm:$0xf0] }
  0x29   :  { %411 = vmatpush.bf16.msra.mxu2 %v1121_v54  ;;  %v1143_v21 = vld [vmem:[#allocation7 + $0x54] sm:$0xf]  ;;  %v1015_v22 = vld [vmem:[#allocation7 + $0x58] sm:$0xf0]  ;;  %v1014_v24 = vor.u32 %v1144_v20, %v1013_v19  ;;  %v1005_v28 = vld [vmem:[#allocation7 + $0x40] sm:$0xf] }
  0x2a   :  { %430 = vmatpush.bf16.msra.mxu3 %v1129_v55  ;;  %v1018_v27 = vor.u32 %v1143_v21, %v1015_v22  ;;  %v1142_v29 = vld [vmem:[#allocation7 + $0x44] sm:$0xf0]  ;;  %v1141_v32 = vld [vmem:[#allocation7 + $0x44] sm:$0xf]  ;;  %v1007_v33 = vld [vmem:[#allocation7 + $0x48] sm:$0xf0] }
  0x2b   :  { %219 = vmatpush.bf16.msra.mxu0 %v862_v34  ;;  %v1010_v40 = vor.u32 %v1141_v32, %v1007_v33  ;;  %v981_v5 = vld [vmem:[#allocation7 + $0x10] sm:$0xf]  ;;  %v1136_v6 = vld [vmem:[#allocation7 + $0x14] sm:$0xf0]  ;;  %v983_v9 = vld [vmem:[#allocation7 + $0x18] sm:$0xf0] }
  0x2c   :  { %238 = vmatpush.bf16.msra.mxu1 %v866_v37  ;;  %v1006_v37 = vor.u32 %v1142_v29, %v1005_v28  ;;  %v973_v11 = vld [vmem:[#allocation7] sm:$0xf]  ;;  %v1133_v13 = vld [vmem:[#allocation7 + $0x4] sm:$0xf]  ;;  %v1156_v20 = vld [vmem:[#allocation8 + $0x38] sm:$0xff] }
  0x2d   :  { %412 = vmatpush.bf16.msra.mxu2 %v1120_v58  ;;  %v1140_v58 = vld [vmem:[#allocation7 + $0x34] sm:$0xf0]  ;;  %v1155_v22 = vld [vmem:[#allocation8 + $0x30] sm:$0xff]  ;;  %v1153_v32 = vld [vmem:[#allocation8 + $0x20] sm:$0xff] }
  0x2e   :  { %431 = vmatpush.bf16.msra.mxu3 %v1128_v59  ;;  %v1139_v59 = vld [vmem:[#allocation7 + $0x34] sm:$0xf]  ;;  %v1164_v21 = vld [vmem:[#allocation8 + $0x78] sm:$0xff]  ;;  %v1161_v33 = vld [vmem:[#allocation8 + $0x60] sm:$0xff] }
  0x2f   :  { %220 = vmatpush.bf16.msra.mxu0 %v854_v44 }
  0x30   :  { %239 = vmatpush.bf16.msra.mxu1 %v858_v45 }
  0x31   :  { %413 = vmatpush.bf16.msra.mxu2 %v1119_v60 }
  0x32   :  { %432 = vmatpush.bf16.msra.mxu3 %v1127_v61  ;;  %v999_v61 = vld [vmem:[#allocation7 + $0x38] sm:$0xf0] }
  0x33   :  { %221 = vmatpush.bf16.msra.mxu0 %v846_v52 }
  0x34   :  { %240 = vmatpush.bf16.msra.mxu1 %v850_v53 }
  0x35   :  { %414 = vmatpush.bf16.msra.mxu2 %v1118_v62  ;;  %v1002_v62 = vor.u32 %v1139_v59, %v999_v61 }
  0x36   :  { %222 = vmatmul.bf16.vlgmr.msra.gmra.mxu0 %v1099_v56  ;;  %433 = vmatpush.bf16.msra.mxu3 %v1126_v63  ;;  %v989_v63 = vld [vmem:[#allocation7 + $0x20] sm:$0xf] }
  0x37   :  { %241 = vmatmul.bf16.vlgmr.msra.gmra.mxu1 %v1099_v56  ;;  %562 = vmatpush.bf16.msrb.mxu0 %v1030_v8  ;;  %v982_v8 = vor.u32 %v1136_v6, %v981_v5 }
  0x38   :  { %581 = vmatpush.bf16.msrb.mxu1 %v1034_v12  ;;  %v1134_v12 = vld [vmem:[#allocation7 + $0x4] sm:$0xf0] }
  0x39   :  { %415 = vmatpush.bf16.msra.mxu2 %v1117_v0  ;;  %v1138_v0 = vld [vmem:[#allocation7 + $0x24] sm:$0xf0]  ;;  %v974_v14 = vor.u32 %v1134_v12, %v973_v11 }
  0x3a   :  { %434 = vmatpush.bf16.msra.mxu3 %v1125_v1  ;;  %v1137_v1 = vld [vmem:[#allocation7 + $0x24] sm:$0xf]  ;;  %v990_v2 = vor.u32 %v1138_v0, %v989_v63 }
  0x3b   :  { %563 = vmatpush.bf16.msrb.mxu0 %v1022_v16 }
  0x3c   :  { %582 = vmatpush.bf16.msrb.mxu1 %v1026_v18  ;;  %v1185_v18 = vld [vmem:[%s1420_s4] ss:$0 sm:$0xff] }
  0x3d   :  { %756 = vmatpush.bf16.msrb.mxu2 %v1156_v20 }
  0x3e   :  { %775 = vmatpush.bf16.msrb.mxu3 %v1164_v21 }
  0x3f   :  { %564 = vmatpush.bf16.msrb.mxu0 %v1014_v24 }
  0x40   :  { %583 = vmatpush.bf16.msrb.mxu1 %v1018_v27 }
  0x41   :  { %757 = vmatpush.bf16.msrb.mxu2 %v1155_v22 }
  0x43   :  { %565 = vmatpush.bf16.msrb.mxu0 %v1006_v37  ;;  %v1152_v37 = vld [vmem:[#allocation8 + $0x18] sm:$0xff] }
  0x44   :  { %584 = vmatpush.bf16.msrb.mxu1 %v1010_v40 }
  0x46   :  { %227 = vmatmul.bf16.gmra.mxu0 %v1100_v57 }
  0x47   :  { %246 = vmatmul.bf16.gmra.mxu1 %v1100_v57  ;;  %v997_v57 = vld [vmem:[#allocation7 + $0x30] sm:$0xf] }
  0x48   :  { %v998_v60 = vor.u32 %v1140_v58, %v997_v57  ;;  %585 = vmatpush.bf16.msrb.mxu1 %v1002_v62 }
  0x4a   :  { %566 = vmatpush.bf16.msrb.mxu0 %v998_v60 }
  0x4e   :  { %567 = vmatpush.bf16.msrb.mxu0 %v990_v2 }
  0x52   :  { %568 = vmatpush.bf16.msrb.mxu0 %v982_v8 }
  0x56   :  { %569 = vmatpush.bf16.msrb.mxu0 %v974_v14 }
  0xb3   :  { %v223_v3 = vpop.f32.mrf.mxu0 }
  0xb4   :  { %v242_v7 = vpop.f32.mrf.mxu1  ;;  %v224_v23 = vadd.f32 %v223_v3, %v118_v15  ;;  %v991_v3 = vld [vmem:[#allocation7 + $0x28] sm:$0xf0] }
  0xb5   :  { %v243_v25 = vadd.f32 %v242_v7, %v119_v17  ;;  %v994_v4 = vor.u32 %v1137_v1, %v991_v3  ;;  %v1135_v7 = vld [vmem:[#allocation7 + $0x14] sm:$0xf] }
  0xb6   :  { %v264_v35 = vmax.f32 %v224_v23, 0.0  ;;  %v986_v10 = vor.u32 %v1135_v7, %v983_v9  ;;  %v1163_v23 = vld [vmem:[#allocation8 + $0x70] sm:$0xff] }
  0xb7   :  { %v265_v38 = vmax.f32 %v243_v25, 0.0  ;;  %586 = vmatpush.bf16.msrb.mxu1 %v994_v4  ;;  %776 = vmatpush.bf16.msrb.mxu3 %v1163_v23  ;;  %v1154_v25 = vld [vmem:[#allocation8 + $0x28] sm:$0xff] }
  0xb8   :  { %758 = vmatpush.bf16.msrb.mxu2 %v1154_v25  ;;  %v1186_v25 = vld [vmem:[%s1424_s8] ss:$0 sm:$0xff]  ;;  %s818_s8 = sshll.u32 %s1323_s16, 4  ;;  %s819_s8 = int_to_ptr.vmem [resolvable:$true] %s818_s8 }
  0xbb   :  { %v225_v26 = vpop.f32.mrf.mxu0  ;;  %587 = vmatpush.bf16.msrb.mxu1 %v986_v10 }
  0xbc   :  { %v226_v30 = vadd.f32 %v225_v26, %v118_v15  ;;  %v244_v31 = vpop.f32.mrf.mxu1  ;;  %v1162_v26 = vld [vmem:[#allocation8 + $0x68] sm:$0xff]  ;;  %759 = vmatpush.bf16.msrb.mxu2 %v1153_v32 }
  0xbd   :  { %v245_v34 = vadd.f32 %v244_v31, %v119_v17  ;;  %777 = vmatpush.bf16.msrb.mxu3 %v1162_v26 }
  0xbe   :  { %v266_v36 = vmax.f32 %v226_v30, 0.0 }
  0xbf   :  { %v267_v39 = vmax.f32 %v245_v34, 0.0 }
  0xc0   :  { %v272_v41 = vpack.c.bf16 %v266_v36, %v264_v35  ;;  %760 = vmatpush.bf16.msrb.mxu2 %v1152_v37 }
  0xc1   :  { %v273_v42 = vpack.c.bf16 %v267_v39, %v265_v38  ;;  %778 = vmatpush.bf16.msrb.mxu3 %v1161_v33 }
  0xc2   :  { %416 = vmatmul.bf16.vlgmr.msra.gmra.mxu2 %v272_v41 }
  0xc3   :  { %435 = vmatmul.bf16.vlgmr.msra.gmra.mxu3 %v273_v42  ;;  %v228_v43 = vpop.f32.mrf.mxu0 }
  0xc4   :  { %v247_v44 = vpop.f32.mrf.mxu1  ;;  %v229_v45 = vadd.f32 %v228_v43, %v118_v15 }
  0xc5   :  { %v248_v46 = vadd.f32 %v247_v44, %v119_v17 }
  0xc6   :  { %v268_v51 = vmax.f32 %v229_v45, 0.0 }
  0xc7   :  { %v269_v53 = vmax.f32 %v248_v46, 0.0 }
  0xcb   :  { %v230_v47 = vpop.f32.mrf.mxu0 }
  0xcc   :  { %v231_v48 = vadd.f32 %v230_v47, %v118_v15  ;;  %v249_v49 = vpop.f32.mrf.mxu1  ;;  %v975_v15 = vld [vmem:[#allocation7 + $0x8] sm:$0xf0] }
  0xcd   :  { %v250_v50 = vadd.f32 %v249_v49, %v119_v17  ;;  %v978_v16 = vor.u32 %v1133_v13, %v975_v15  ;;  %v1160_v49 = vld [vmem:[#allocation8 + $0x58] sm:$0xff] }
  0xce   :  { %v270_v52 = vmax.f32 %v231_v48, 0.0  ;;  %779 = vmatpush.bf16.msrb.mxu3 %v1160_v49 }
  0xcf   :  { %v271_v54 = vmax.f32 %v250_v50, 0.0  ;;  %588 = vmatpush.bf16.msrb.mxu1 %v978_v16  ;;  %v1151_v50 = vld [vmem:[#allocation8 + $0x10] sm:$0xff] }
  0xd0   :  { %v274_v55 = vpack.c.bf16 %v270_v52, %v268_v51  ;;  %v1159_v51 = vld [vmem:[#allocation8 + $0x50] sm:$0xff]  ;;  %761 = vmatpush.bf16.msrb.mxu2 %v1151_v50  ;;  %v1150_v52 = vld [vmem:[#allocation8 + $0x8] sm:$0xff] }
  0xd1   :  { %v275_v56 = vpack.c.bf16 %v271_v54, %v269_v53  ;;  %v1158_v53 = vld [vmem:[#allocation8 + $0x48] sm:$0xff]  ;;  %v1149_v54 = vld [vmem:[#allocation8] sm:$0xff] }
  0xd2   :  { %421 = vmatmul.bf16.gmra.mxu2 %v274_v55  ;;  %780 = vmatpush.bf16.msrb.mxu3 %v1159_v51  ;;  %v1157_v55 = vld [vmem:[#allocation8 + $0x40] sm:$0xff] }
  0xd3   :  { %440 = vmatmul.bf16.gmra.mxu3 %v275_v56  ;;  %v476_v56 = vld [vmem:[%s1422_s6] sm:$0x3] }
  0xd4   :  { %762 = vmatpush.bf16.msrb.mxu2 %v1150_v52  ;;  %v478_v59 = vperm.slane %v476_v56, 0  ;;  %v479_v60 = vperm.slane %v476_v56, 1 }
  0xd6   :  { %781 = vmatpush.bf16.msrb.mxu3 %v1158_v53 }
  0xd8   :  { %763 = vmatpush.bf16.msrb.mxu2 %v1149_v54 }
  0xda   :  { %782 = vmatpush.bf16.msrb.mxu3 %v1157_v55 }
 0x145   :  { %v417_v17 = vpop.f32.mrf.mxu2 }
 0x146   :  { %v436_v19 = vpop.f32.mrf.mxu3  ;;  %v418_v24 = vadd.f32 %v1185_v18, %v417_v17 }
 0x148   :  { %v437_v28 = vadd.f32 %v436_v19, %v418_v24 }
 0x14a   :  { %v454_v34 = vmax.f32 %v437_v28, 0.0 }
 0x14d   :  { %v419_v27 = vpop.f32.mrf.mxu2 }
 0x14e   :  { %v420_v29 = vadd.f32 %v1185_v18, %v419_v27  ;;  %v438_v30 = vpop.f32.mrf.mxu3 }
 0x150   :  { %v439_v31 = vadd.f32 %v438_v30, %v420_v29 }
 0x152   :  { %v455_v35 = vmax.f32 %v439_v31, 0.0 }
 0x154   :  { %v458_v36 = vpack.c.bf16 %v455_v35, %v454_v34 }
 0x155   :  { %v422_v38 = vpop.f32.mrf.mxu2 }
 0x156   :  { %v441_v39 = vpop.f32.mrf.mxu3  ;;  %570 = vmatmul.bf16.vlgmr.msrb.gmra.mxu0 %v458_v36  ;;  %589 = vmatmul.bf16.vlgmr.msrb.gmra.mxu1 %v458_v36  ;;  %v423_v40 = vadd.f32 %v1185_v18, %v422_v38 }
 0x158   :  { %v442_v42 = vadd.f32 %v441_v39, %v423_v40 }
 0x15a   :  { %v456_v46 = vmax.f32 %v442_v42, 0.0 }
 0x15d   :  { %v424_v41 = vpop.f32.mrf.mxu2 }
 0x15e   :  { %v425_v43 = vadd.f32 %v1185_v18, %v424_v41  ;;  %v443_v44 = vpop.f32.mrf.mxu3 }
 0x160   :  { %v444_v45 = vadd.f32 %v443_v44, %v425_v43 }
 0x162   :  { %v457_v47 = vmax.f32 %v444_v45, 0.0 }
 0x164   :  { %v459_v48 = vpack.c.bf16 %v457_v47, %v456_v46 }
 0x166   :  { %575 = vmatmul.bf16.gmra.mxu0 %v459_v48  ;;  %594 = vmatmul.bf16.gmra.mxu1 %v459_v48 }
 0x1d3   :  { %v571_v57 = vpop.f32.mrf.mxu0  ;;  %v590_v58 = vpop.f32.mrf.mxu1 }
 0x1d4   :  { %v572_v61 = vadd.f32 %v571_v57, %v478_v59  ;;  %v591_v62 = vadd.f32 %v590_v58, %v479_v60 }
 0x1d6   :  { %v612_v3 = vmax.f32 %v572_v61, 0.0  ;;  %v613_v4 = vmax.f32 %v591_v62, 0.0 }
 0x1db   :  { %v573_v63 = vpop.f32.mrf.mxu0  ;;  %v592_v0 = vpop.f32.mrf.mxu1 }
 0x1dc   :  { %v574_v1 = vadd.f32 %v573_v63, %v478_v59  ;;  %v593_v2 = vadd.f32 %v592_v0, %v479_v60 }
 0x1de   :  { %v614_v5 = vmax.f32 %v574_v1, 0.0  ;;  %v615_v6 = vmax.f32 %v593_v2, 0.0 }
 0x1e0   :  { %v620_v7 = vpack.c.bf16 %v614_v5, %v612_v3  ;;  %v621_v8 = vpack.c.bf16 %v615_v6, %v613_v4 }
 0x1e2   :  { %764 = vmatmul.bf16.vlgmr.msrb.gmra.mxu2 %v620_v7  ;;  %783 = vmatmul.bf16.vlgmr.msrb.gmra.mxu3 %v621_v8 }
 0x1e3   :  { %v576_v9 = vpop.f32.mrf.mxu0  ;;  %v595_v10 = vpop.f32.mrf.mxu1 }
 0x1e4   :  { %v577_v11 = vadd.f32 %v576_v9, %v478_v59  ;;  %v596_v12 = vadd.f32 %v595_v10, %v479_v60 }
 0x1e6   :  { %v616_v17 = vmax.f32 %v577_v11, 0.0  ;;  %v617_v18 = vmax.f32 %v596_v12, 0.0 }
 0x1eb   :  { %v578_v13 = vpop.f32.mrf.mxu0  ;;  %v597_v14 = vpop.f32.mrf.mxu1 }
 0x1ec   :  { %v579_v15 = vadd.f32 %v578_v13, %v478_v59  ;;  %v598_v16 = vadd.f32 %v597_v14, %v479_v60 }
 0x1ee   :  { %v618_v19 = vmax.f32 %v579_v15, 0.0  ;;  %v619_v20 = vmax.f32 %v598_v16, 0.0 }
 0x1f0   :  { %v622_v21 = vpack.c.bf16 %v618_v19, %v616_v17  ;;  %v623_v22 = vpack.c.bf16 %v619_v20, %v617_v18 }
 0x1f2   :  { %769 = vmatmul.bf16.gmra.mxu2 %v622_v21  ;;  %788 = vmatmul.bf16.gmra.mxu3 %v623_v22 }
 0x265   :  { %v765_v23 = vpop.f32.mrf.mxu2  ;;  %v784_v24 = vpop.f32.mrf.mxu3 }
 0x266   :  { %v766_v26 = vadd.f32 %v1186_v25, %v765_v23 }
 0x268   :  { %v785_v29 = vadd.f32 %v784_v24, %v766_v26 }
 0x26a   :  { %v802_v32 = vmax.f32 %v785_v29, 0.0 }
 0x26d   :  { %v767_v27 = vpop.f32.mrf.mxu2  ;;  %v786_v28 = vpop.f32.mrf.mxu3 }
 0x26e   :  { %v768_v30 = vadd.f32 %v1186_v25, %v767_v27 }
 0x270   :  { %v787_v31 = vadd.f32 %v786_v28, %v768_v30 }
 0x272   :  { %v803_v33 = vmax.f32 %v787_v31, 0.0 }
 0x274   :  { %v1168_v34 = vpack.c.bf16 %v803_v33, %v802_v32 }
 0x275   :  { %v770_v35 = vpop.f32.mrf.mxu2  ;;  %v789_v36 = vpop.f32.mrf.mxu3 }
 0x276   :  { %1169 = vst [vmem:[#allocation10] sm:$0xff] %v1168_v34   ;;  %v771_v37 = vadd.f32 %v1186_v25, %v770_v35 }
 0x278   :  { %v790_v39 = vadd.f32 %v789_v36, %v771_v37 }
 0x27a   :  { %v804_v43 = vmax.f32 %v790_v39, 0.0 }
 0x27d   :  { %v772_v38 = vpop.f32.mrf.mxu2  ;;  %v791_v41 = vpop.f32.mrf.mxu3 }
 0x27e   :  { %v773_v40 = vadd.f32 %v1186_v25, %v772_v38 }
 0x280   :  { %v792_v42 = vadd.f32 %v791_v41, %v773_v40 }
 0x282   :  { %v805_v44 = vmax.f32 %v792_v42, 0.0 }
 0x284   :  { %v1173_v45 = vpack.c.bf16 %v805_v44, %v804_v43 }
 0x286   :  { %1175 = vst [vmem:[#allocation10 + $0x8] sm:$0xff] %v1173_v45  }
 0x287   :  { %826 = dma.vmem_to_hbm [thread:$0]  %s819_s8, 256, %s821_s3, [#allocation4], %s1316_s17, %s1316_s17, %s1317_s18  }
 0x288   :  { %1313 = dma.done.wait [#allocation4], 256  }
 0x289   :  { %1314 = vsyncadd [#allocation4], 4294967040 }
 0x28a   :  { %831 = vsyncpa [#allocation3], 1 }
 0x28b   :  { %832 = vsyncpa [#allocation6], 1 }
 0x28c   :  { %833 = vsyncpa [#allocation9], 1 }
 0x28d   :  { %834 = vsyncpa [#allocation4], 1 }

</bundles_post_ra>
